<compile_context>
chip_gen: v5e
topology: v5e:2x2
jax: 0.10.0
libtpu: 0.0.40
codegen_flags: <defaults>
</compile_context>

<pallas_src>
import jax
import jax.numpy as jnp
from jax.experimental import pallas as pl
from jax.experimental.pallas import tpu as pltpu


# ------------------------------ tuning knobs ------------------------------ #

_PER_BUF_BYTES = 4 * 1024 * 1024       # ~4 MiB per streamed block (v7x-friendly)
_VMEM_LIMIT_BYTES = 32 * 1024 * 1024   # raised scoped VMEM (needed on v5e, safe on all)
_MAX_LANE_TILE = 8192                  # lane-tile cap, multiple of 128
_MAX_ROW_TILE = 1024                   # row-tile cap (keeps (rows,1) param columns small)
_XLA_FALLBACK_ELEMS = 1 << 20          # below this, a fused XLA elementwise op wins


def _pick_tiles(rows, cols, in_itemsize, out_itemsize):
    """Lane-dense (tile_r, tile_l) block sized to ~_PER_BUF_BYTES per buffer."""
    big = max(in_itemsize, out_itemsize)
    small = min(in_itemsize, out_itemsize)
    sub = {4: 8, 2: 16, 1: 32}.get(small, 8)          # sublane packing multiple
    if cols >= 128:
        tile_l = min((cols // 128) * 128, _MAX_LANE_TILE)   # multiple of 128
    else:
        tile_l = cols                                       # full dim (tiny case)
    cap_r = (_PER_BUF_BYTES // (tile_l * big)) // sub * sub
    cap_r = max(sub, min(cap_r, _MAX_ROW_TILE))
    if rows >= sub:
        tile_r = min(cap_r, (rows // sub) * sub)            # multiple of sub
    else:
        tile_r = rows                                       # full dim
    return tile_r, tile_l


# ----------------------------- Pallas kernels ----------------------------- #

def _rowwise_affine_kernel(scale_ref, shift_ref, x_ref, o_ref):
    """o = x * scale_col + shift_col; (tile_r,1) columns broadcast along lanes."""
    x = x_ref[...].astype(jnp.float32)
    o_ref[...] = (x * scale_ref[...] + shift_ref[...]).astype(o_ref.dtype)


def _affine_kernel(param_ref, x_ref, o_ref):
    """Elementwise affine: o = x * param[0] + param[1] (scalars in SMEM)."""
    x = x_ref[...].astype(jnp.float32)
    o_ref[...] = (x * param_ref[0] + param_ref[1]).astype(o_ref.dtype)


# ------------------------------ transforms -------------------------------- #

def make_normalize(mean, std, *, min_pallas_elems=_XLA_FALLBACK_ELEMS):
    """Per-channel normalize for NCHW inputs, executed in a Pallas kernel."""
    mean = jnp.asarray(mean, jnp.float32)          # (C,)
    std = jnp.asarray(std, jnp.float32)            # (C,)
    # Fold (x - mean) / std  ->  x * scale + shift.
    scale = 1.0 / std
    shift = -mean / std

    def apply(x):
        N, C, H, W = x.shape
        out_dtype = x.dtype if jnp.issubdtype(x.dtype, jnp.floating) else jnp.float32
        if x.size < min_pallas_elems:
            # Tiny tensor: let XLA fuse it, skip the kernel launch entirely.
            return ((x.astype(jnp.float32) - mean[None, :, None, None])
                    / std[None, :, None, None]).astype(out_dtype)

        rows, cols = N * C, H * W
        x2 = x.reshape(rows, cols)                 # free collapse, lane axis = H*W
        # Per-row params (row r -> channel r % C): tiny (N*C,1) f32 columns.
        scale_col = jnp.tile(scale, N)[:, None]
        shift_col = jnp.tile(shift, N)[:, None]

        in_item = jnp.dtype(x.dtype).itemsize
        out_item = jnp.dtype(out_dtype).itemsize
        tile_r, tile_l = _pick_tiles(rows, cols, in_item, out_item)
        grid = (pl.cdiv(rows, tile_r), pl.cdiv(cols, tile_l))   # edge blocks masked

        nbytes = rows * cols * (in_item + out_item)
        out = pl.pallas_call(
            _rowwise_affine_kernel,
            out_shape=jax.ShapeDtypeStruct((rows, cols), out_dtype),
            grid=grid,
            in_specs=[
                pl.BlockSpec((tile_r, 1), lambda r, l: (r, 0)),        # scale col
                pl.BlockSpec((tile_r, 1), lambda r, l: (r, 0)),        # shift col
                pl.BlockSpec((tile_r, tile_l), lambda r, l: (r, l)),   # x block
            ],
            out_specs=pl.BlockSpec((tile_r, tile_l), lambda r, l: (r, l)),
            compiler_params=pltpu.CompilerParams(
                # TODO(synk): on v7x verify in a profile that the grid actually
                # shards across both TensorCores; if not, promote the leading
                # axis to pltpu.CORE_PARALLEL (or split via pl.core_map).
                dimension_semantics=("parallel", "parallel"),
                vmem_limit_bytes=_VMEM_LIMIT_BYTES),
            cost_estimate=pl.CostEstimate(
                flops=2 * rows * cols, transcendentals=0, bytes_accessed=nbytes),
        )(scale_col, shift_col, x2)

        return out.reshape(N, C, H, W)

    return apply


def make_scale_shift(scale, shift, *, min_pallas_elems=_XLA_FALLBACK_ELEMS):
    """Generic elementwise affine transform executed in a Pallas kernel."""
    # Runtime operand (SMEM) instead of baked-in constants -> one compilation
    # serves every (scale, shift) pair.
    params = jnp.asarray([scale, shift], jnp.float32)

    def apply(x):
        out_dtype = x.dtype if jnp.issubdtype(x.dtype, jnp.floating) else jnp.float32
        # TODO(synk): integer inputs promote to float32 output; confirm that
        # this matches the intended dtype contract of the original transform.
        if x.size < min_pallas_elems:
            return (x.astype(jnp.float32) * params[0] + params[1]).astype(out_dtype)

        # Collapse leading dims only (always a free reshape); never pad.
        view = x.reshape(1, -1) if x.ndim < 2 else x.reshape(-1, x.shape[-1])
        rows, cols = view.shape

        in_item = jnp.dtype(x.dtype).itemsize
        out_item = jnp.dtype(out_dtype).itemsize
        tile_r, tile_l = _pick_tiles(rows, cols, in_item, out_item)
        grid = (pl.cdiv(rows, tile_r), pl.cdiv(cols, tile_l))   # edge blocks masked

        nbytes = rows * cols * (in_item + out_item)
        out = pl.pallas_call(
            _affine_kernel,
            out_shape=jax.ShapeDtypeStruct((rows, cols), out_dtype),
            grid=grid,
            in_specs=[
                pl.BlockSpec(memory_space=pltpu.MemorySpace.SMEM),     # (2,) params
                pl.BlockSpec((tile_r, tile_l), lambda r, l: (r, l)),
            ],
            out_specs=pl.BlockSpec((tile_r, tile_l), lambda r, l: (r, l)),
            compiler_params=pltpu.CompilerParams(
                dimension_semantics=("parallel", "parallel"),
                vmem_limit_bytes=_VMEM_LIMIT_BYTES),
            cost_estimate=pl.CostEstimate(
                flops=2 * rows * cols, transcendentals=0, bytes_accessed=nbytes),
        )(params, view)

        return out.reshape(x.shape)

    return apply


# ----------------------------- BatchTransform ----------------------------- #

class BatchTransform:
    """JAX port of the PyTorch BatchTransform module (forward path)."""

    def __init__(self, transform):
        self.transform = transform

    def __getitem__(self, index):
        if isinstance(self.transform, dict):
            return self.transform.get(index, self.transform.get('_default', None))
        return self.transform

    def forward(self, x_dict):
        x_out = dict(x_dict)
        for key, val in x_dict.items():
            t = self[key]
            x_out[key] = t(val) if t is not None else val
        return x_out

    __call__ = forward

    def inverse(self, x_trans_dict):
        # TODO(synk): only meaningful for transforms exposing an `.inverse`
        # attribute (host-side dispatch, same as the PyTorch module).
        x_out = dict(x_trans_dict)
        for key, val in x_trans_dict.items():
            t = self[key]
            if t is not None and hasattr(t, 'inverse'):
                x_out[key] = t.inverse(val)
            else:
                x_out[key] = val
        return x_out

    def __repr__(self):
        return f'{self.__class__.__name__}(transform={self.transform})'


# --------------------------------- main ------------------------------------ #

if __name__ == "__main__":
    key = jax.random.PRNGKey(0)
    k_img, k_mask, k_feat = jax.random.split(key, 3)

    N, C, H, W = 2, 4, 16, 16
    image = jax.random.normal(k_img, (N, C, H, W), dtype=jnp.float32)
    mask = jax.random.uniform(k_mask, (N, H, W), dtype=jnp.float32)
    # Non-128-divisible trailing dim -> exercises masked edge blocks (no padding).
    feat = jax.random.normal(k_feat, (3, 300), dtype=jnp.float32)
    label = jnp.arange(N, dtype=jnp.int32)   # no registered transform -> passthrough

    # Deterministic "parameters" for the per-channel normalize transform.
    ch_mean = 0.1 * jnp.arange(C, dtype=jnp.float32)
    ch_std = 1.0 + 0.05 * jnp.arange(C, dtype=jnp.float32)

    # min_pallas_elems=0 so the tiny demo shapes still exercise the Pallas
    # kernels (the production default of 1<<20 routes small tensors to XLA).
    bt = BatchTransform({
        'image': make_normalize(ch_mean, ch_std, min_pallas_elems=0),
        'mask': make_scale_shift(2.0, 0.5, min_pallas_elems=0),
        'feat': make_scale_shift(0.5, -1.0, min_pallas_elems=0),
        # no '_default' entry: unlisted keys (e.g. 'label') pass through unchanged
    })

    out = bt({'image': image, 'mask': mask, 'feat': feat, 'label': label})
    jax.block_until_ready(out)

    # Reference check (plain JAX).
    ref_image = (image - ch_mean[None, :, None, None]) / ch_std[None, :, None, None]
    ref_mask = mask * 2.0 + 0.5
    ref_feat = feat * 0.5 - 1.0
    assert out['image'].dtype == image.dtype
    assert out['mask'].dtype == mask.dtype
    assert out['feat'].shape == feat.shape
    assert jnp.allclose(out['image'], ref_image, atol=1e-5)
    assert jnp.allclose(out['mask'], ref_mask, atol=1e-5)
    assert jnp.allclose(out['feat'], ref_feat, atol=1e-5)
    assert (out['label'] == label).all()

    print("KERNEL_OK")
</pallas_src>

<mosaic_0001>
module attributes {stable_mosaic.version = 11 : i64} {
  func.func @_rowwise_affine_kernel(%arg0: i32, %arg1: i32, %arg2: memref<8x1xf32, #tpu.memory_space<vmem>>, %arg3: memref<8x1xf32, #tpu.memory_space<vmem>>, %arg4: memref<8x256xf32, #tpu.memory_space<vmem>>, %arg5: memref<8x256xf32, #tpu.memory_space<vmem>>) attributes {dimension_semantics = [#tpu.dimension_semantics<parallel>, #tpu.dimension_semantics<parallel>], iteration_bounds = array<i64: 1, 1>, scalar_prefetch = 0 : i64, scratch_operands = 0 : i64, tpu.core_type = #tpu.core_type<tc>, window_params = [{transform_indices = @transform_0, window_bounds = array<i64: 8, 1>}, {transform_indices = @transform_1, window_bounds = array<i64: 8, 1>}, {transform_indices = @transform_2, window_bounds = array<i64: 8, 256>}, {transform_indices = @transform_3, window_bounds = array<i64: 8, 256>}]} {
    %c0 = arith.constant 0 : index
    %c0_0 = arith.constant 0 : index
    %0 = vector.load %arg4[%c0, %c0_0] : memref<8x256xf32, #tpu.memory_space<vmem>>, vector<8x256xf32>
    %c0_1 = arith.constant 0 : index
    %c0_2 = arith.constant 0 : index
    %1 = vector.load %arg2[%c0_1, %c0_2] : memref<8x1xf32, #tpu.memory_space<vmem>>, vector<8x1xf32>
    %2 = vector.broadcast %1 : vector<8x1xf32> to vector<8x256xf32>
    %3 = arith.mulf %0, %2 : vector<8x256xf32>
    %c0_3 = arith.constant 0 : index
    %c0_4 = arith.constant 0 : index
    %4 = vector.load %arg3[%c0_3, %c0_4] : memref<8x1xf32, #tpu.memory_space<vmem>>, vector<8x1xf32>
    %5 = vector.broadcast %4 : vector<8x1xf32> to vector<8x256xf32>
    %6 = arith.addf %3, %5 : vector<8x256xf32>
    %c0_5 = arith.constant 0 : index
    %c0_6 = arith.constant 0 : index
    %7 = vector.load %arg5[%c0_5, %c0_6] : memref<8x256xf32, #tpu.memory_space<vmem>>, vector<8x256xf32>
    tpu.vector_store %arg5[%c0_5, %c0_6], %6 {strides = array<i32>} : memref<8x256xf32, #tpu.memory_space<vmem>>, vector<8x256xf32>,
    return
  }
  func.func @transform_0(%arg0: i32, %arg1: i32) -> (i32, i32) {
    %c0_i32 = arith.constant 0 : i32
    %c0_i32_0 = arith.constant 0 : i32
    return %arg0, %c0_i32 : i32, i32
  }
  func.func @transform_1(%arg0: i32, %arg1: i32) -> (i32, i32) {
    %c0_i32 = arith.constant 0 : i32
    %c0_i32_0 = arith.constant 0 : i32
    return %arg0, %c0_i32 : i32, i32
  }
  func.func @transform_2(%arg0: i32, %arg1: i32) -> (i32, i32) {
    %c0_i32 = arith.constant 0 : i32
    return %arg0, %arg1 : i32, i32
  }
  func.func @transform_3(%arg0: i32, %arg1: i32) -> (i32, i32) {
    %c0_i32 = arith.constant 0 : i32
    return %arg0, %arg1 : i32, i32
  }
}

</mosaic_0001>

<bundles_post_ra>
// kernel: tpu_custom_call.1
= control target key start
LH: loop header
LB: loop body
LE: loop exit
PB: predicated region body
PF: predicated region fallthrough
CT: control target
= control target key end

     0   :  { %s117_s0 = inlined_call_operand.vmem [shape: f32[8,1], index: 0, kind: input, shape index: {}]   ;;  %s118_s1 = inlined_call_operand.vmem [shape: f32[8,1], index: 1, kind: input, shape index: {}]   ;;  %s119_s2 = inlined_call_operand.vmem [shape: f32[8,256], index: 2, kind: input, shape index: {}]   ;;  %s120_s3 = inlined_call_operand.hbm [shape: f32[8,256], index: 3, kind: output, shape index: {}]  }
   0x1   :  { %v17_v0 = vld [vmem:[%s117_s0] sm:$0xff] }
   0x2   :  { %8 = vsyncpa [#allocation3], 0  ;;  %v80_v1 = vmov 0   ;;  %v25_v2 = vld [vmem:[%s118_s1] sm:$0xff]  ;;  %v16_v5 = vld [vmem:[%s119_s2 + $0x8] sm:$0xff]  ;;  %s81_s0 = smov [#allocation2]  }
   0x3   :  { %53 = vset.pattern.permute.xlu0 %v80_v1  ;;  %v15_v4 = vld [vmem:[%s119_s2] sm:$0xff]  ;;  %s40_s20 = sshll.u32 %s81_s0, 4  ;;  %s42_s23 = sshll.u32 %s120_s3, 4  ;;  %s41_s20 = int_to_ptr.vmem [resolvable:$true] %s40_s20  ;;  %s43_s23 = int_to_ptr.hbm [resolvable:$true] %s42_s23 }
   0x4   :  { %20 = vperm.xlu0 %53, %v17_v0  }
   0xc   :  { %28 = vperm.xlu0 %53, %v25_v2  }
  0x76   :  { %v21_v3 = vpop.permute.xlu0 %20 }
  0x77   :  { %v23_v6 = vmul.f32 %v21_v3, %v15_v4  ;;  %v24_v7 = vmul.f32 %v21_v3, %v16_v5 }
  0x7e   :  { %v29_v8 = vpop.permute.xlu0 %28 }
  0x7f   :  { %v31_v9 = vadd.f32 %v29_v8, %v23_v6  ;;  %v32_v10 = vadd.f32 %v29_v8, %v24_v7 }
  0x81   :  { %33 = vst [vmem:[#allocation2] sm:$0xff] %v31_v9 }
  0x82   :  { %34 = vst [vmem:[#allocation2 + $0x8] sm:$0xff] %v32_v10 }
  0x83   :  { %45 = dma.vmem_to_hbm [thread:$0]  %s41_s20, 256, %s43_s23, [#allocation3]  }
  0x84   :  { %78 = dma.done.wait [#allocation3], 256  }
  0x85   :  { %79 = vsyncadd [#allocation3], 4294967040 }
  0x86   :  { %50 = vsyncpa [#allocation3], 1 }

</bundles_post_ra>
